<compile_context>
chip_gen: v7x
topology: tpu7x:2x2x1
jax: 0.10.0
libtpu: 0.0.40
codegen_flags: <defaults>
</compile_context>

<pallas_src>
import jax
import jax.numpy as jnp
from jax.experimental import pallas as pl
from jax.experimental.pallas import tpu as pltpu


_PACK = 8  # logical rows packed per lane-row: K = _PACK * in_channels


def _mape2nxn_kernel(x_ref, w_ref, b_ref, o_ref):
    # Single fused affine layer on the MXU, f32 accumulation, f32 bias add.
    y = jnp.dot(x_ref[...], w_ref[...], preferred_element_type=jnp.float32)
    o_ref[...] = (y + b_ref[...]).astype(o_ref.dtype)


def _round_up(a, b):
    return ((a + b - 1) // b) * b


def mape2nxn_forward(x, w1, b1, w2, b2, *, tile_rows=8192,
                     min_rows_for_pallas=1024, compute_dtype=None):
    """x: [..., in_channels] -> [..., out_channels].

    w1: [in, hidden], b1: [1, hidden] (or [hidden]), w2: [hidden, out],
    b2: [1, out] (or [out]).  compute_dtype (e.g. jnp.bfloat16) controls the
    matmul input dtype; accumulation, bias add and output stay f32 / x.dtype.
    """
    f32 = jnp.float32
    in_channels = w1.shape[0]
    out_channels = w2.shape[1]
    lead_shape = x.shape[:-1]
    out_dtype = x.dtype

    # Fold the two affine layers in f32 (dropout == identity at inference,
    # forward never applies ReLU).  Tiny XLA ops; constant-folded under jit.
    w_fused = jnp.dot(w1.astype(f32), w2.astype(f32))                      # [in, out]
    b_fused = (jnp.dot(b1.astype(f32).reshape(1, -1), w2.astype(f32))
               + b2.astype(f32).reshape(1, -1))                            # [1, out]

    mm_dtype = compute_dtype if compute_dtype is not None else f32

    x2d = x.reshape(-1, in_channels)
    m = x2d.shape[0]
    # NOTE: ideally x already arrives in `mm_dtype`; a wrapper-side cast writes
    # one extra copy of x to HBM.
    x2d = x2d.astype(mm_dtype)

    # Tiny inputs: Pallas launch overhead dwarfs the work; let XLA do the
    # (already fused) affine instead.
    if m < min_rows_for_pallas:
        y = jnp.dot(x2d, w_fused.astype(mm_dtype),
                    preferred_element_type=f32) + b_fused
        return y.astype(out_dtype).reshape(*lead_shape, out_channels)

    # Pack _PACK rows into the contraction dim (free row-major bitcast in HBM).
    pad = (-m) % _PACK
    if pad:  # only when the flattened row count is not a multiple of 8
        x2d = jnp.pad(x2d, ((0, pad), (0, 0)))
    m_rows = m + pad
    m8 = m_rows // _PACK
    k = _PACK * in_channels       # 256
    n = _PACK * out_channels      # 128
    x_packed = x2d.reshape(m8, k)

    # Block-diagonal fused weight (folded in f32, then cast) and tiled bias.
    w_bd = jnp.kron(jnp.eye(_PACK, dtype=f32), w_fused).astype(mm_dtype)  # [k, n]
    b_bd = jnp.tile(b_fused, (1, _PACK))                                   # [1, n] f32

    # Row tiling over packed rows; keep the grid even so both v7x TensorCores
    # get balanced work.  Ragged boundary blocks are masked by Pallas (no
    # wrapper-side pad/slice copies of x or the output).
    tile_packed = _round_up(max(tile_rows // _PACK, 8), 8)
    if m8 <= tile_packed:
        tm8 = m8
        n_blocks = 1
    else:
        tm8 = tile_packed
        n_blocks = pl.cdiv(m8, tm8)
        if n_blocks % 2 == 1:  # balance across 2 TensorCores (v7x)
            tm8 = _round_up(pl.cdiv(m8, n_blocks + 1), 8)
            n_blocks = pl.cdiv(m8, tm8)
    grid = (n_blocks,)

    itemsize = jnp.dtype(mm_dtype).itemsize
    cost = pl.CostEstimate(
        flops=2 * m8 * k * n,
        transcendentals=0,
        bytes_accessed=(m8 * k + k * n) * itemsize + n * 4
        + m8 * n * jnp.dtype(out_dtype).itemsize,
    )

    out = pl.pallas_call(
        _mape2nxn_kernel,
        out_shape=jax.ShapeDtypeStruct((m8, n), out_dtype),
        grid=grid,
        in_specs=[
            pl.BlockSpec((tm8, k), lambda i: (i, 0)),   # packed x rows (pipelined)
            pl.BlockSpec((k, n), lambda i: (0, 0)),     # fused block-diag W (resident)
            pl.BlockSpec((1, n), lambda i: (0, 0)),     # fused bias (resident)
        ],
        out_specs=pl.BlockSpec((tm8, n), lambda i: (i, 0)),
        compiler_params=pltpu.CompilerParams(
            dimension_semantics=("parallel",),          # megacore sharding on v7x
            vmem_limit_bytes=32 * 1024 * 1024,
        ),
        cost_estimate=cost,
    )(x_packed, w_bd, b_bd)

    y = out.reshape(m_rows, out_channels)               # free bitcast back
    if pad:
        y = y[:m]
    return y.reshape(*lead_shape, out_channels)


def init_params(key, in_channels, hidden_channels, out_channels, dtype=jnp.float32):
    """Deterministic init mimicking PyTorch nn.Linear default U(-1/sqrt(fan_in), ...).

    Weights stored already transposed to [in, out] layout for the kernel.
    """
    k1, k2, k3, k4 = jax.random.split(key, 4)
    bound1 = 1.0 / (in_channels ** 0.5)
    bound2 = 1.0 / (hidden_channels ** 0.5)
    w1 = jax.random.uniform(k1, (in_channels, hidden_channels), dtype, -bound1, bound1)
    b1 = jax.random.uniform(k2, (1, hidden_channels), dtype, -bound1, bound1)
    w2 = jax.random.uniform(k3, (hidden_channels, out_channels), dtype, -bound2, bound2)
    b2 = jax.random.uniform(k4, (1, out_channels), dtype, -bound2, bound2)
    return w1, b1, w2, b2


if __name__ == "__main__":
    in_channels, hidden_channels, out_channels = 32, 64, 16

    key = jax.random.PRNGKey(0)
    kx, kp, kx2 = jax.random.split(key, 3)
    w1, b1, w2, b2 = init_params(kp, in_channels, hidden_channels, out_channels)

    def ref_forward(x):
        # Unfused reference matching the PyTorch forward (eval mode, f32).
        x2 = x.reshape(-1, in_channels).astype(jnp.float32)
        h = jnp.dot(x2, w1, preferred_element_type=jnp.float32) + b1
        y = jnp.dot(h, w2, preferred_element_type=jnp.float32) + b2
        return y.reshape(*x.shape[:-1], out_channels)

    # --- small, module-typical shape: force the Pallas path (single block) ---
    batch, seq = 2, 8
    x_small = jax.random.normal(kx, (batch, seq, in_channels), jnp.float32)
    y_small = jax.block_until_ready(
        mape2nxn_forward(x_small, w1, b1, w2, b2, min_rows_for_pallas=0))
    assert y_small.shape == (batch, seq, out_channels)
    assert jnp.allclose(y_small, ref_forward(x_small), atol=1e-4, rtol=1e-4)

    # --- larger M: multi-block even grid with a ragged (masked) last block ---
    m_big = 6000
    x_big = jax.random.normal(kx2, (m_big, in_channels), jnp.float32)
    y_big = jax.block_until_ready(
        mape2nxn_forward(x_big, w1, b1, w2, b2, tile_rows=2048))
    assert y_big.shape == (m_big, out_channels)
    assert jnp.allclose(y_big, ref_forward(x_big), atol=1e-4, rtol=1e-4)

    # --- bf16 compute path (f32 fold, f32 accumulation, f32 output) ---
    y_bf16 = jax.block_until_ready(
        mape2nxn_forward(x_big, w1, b1, w2, b2, tile_rows=2048,
                         compute_dtype=jnp.bfloat16))
    assert y_bf16.shape == (m_big, out_channels)
    assert jnp.allclose(y_bf16, ref_forward(x_big), atol=5e-2, rtol=5e-2)

    # --- tiny-M fallback path (plain XLA, same fused math) ---
    y_fb = jax.block_until_ready(mape2nxn_forward(x_small, w1, b1, w2, b2))
    assert jnp.allclose(y_fb, ref_forward(x_small), atol=1e-4, rtol=1e-4)

    print("KERNEL_OK")
</pallas_src>

<mosaic_0001>
module attributes {stable_mosaic.version = 11 : i64} {
  func.func @_mape2nxn_kernel(%arg0: i32, %arg1: memref<2x256xf32, #tpu.memory_space<vmem>>, %arg2: memref<256x128xf32, #tpu.memory_space<vmem>>, %arg3: memref<1x128xf32, #tpu.memory_space<vmem>>, %arg4: memref<2x128xf32, #tpu.memory_space<vmem>>) attributes {dimension_semantics = [#tpu.dimension_semantics<parallel>], iteration_bounds = array<i64: 1>, scalar_prefetch = 0 : i64, scratch_operands = 0 : i64, tpu.core_type = #tpu.core_type<tc>, window_params = [{transform_indices = @transform_0, window_bounds = array<i64: 2, 256>}, {pipeline_mode = #tpu.pipeline_mode<synchronous>, transform_indices = @transform_1, window_bounds = array<i64: 256, 128>}, {pipeline_mode = #tpu.pipeline_mode<synchronous>, transform_indices = @transform_2, window_bounds = array<i64: 1, 128>}, {transform_indices = @transform_3, window_bounds = array<i64: 2, 128>}]} {
    %c0 = arith.constant 0 : index
    %c0_0 = arith.constant 0 : index
    %0 = vector.load %arg1[%c0, %c0_0] : memref<2x256xf32, #tpu.memory_space<vmem>>, vector<2x256xf32>
    %c0_1 = arith.constant 0 : index
    %c0_2 = arith.constant 0 : index
    %1 = vector.load %arg2[%c0_1, %c0_2] : memref<256x128xf32, #tpu.memory_space<vmem>>, vector<256x128xf32>
    %cst = arith.constant dense<0.000000e+00> : vector<2x128xf32>
    %2 = tpu.matmul %0, %1, %cst {dimension_numbers = #tpu.dot_dimension_numbers<[1], [0], [0], [1], [0, 0, 1, 1], [], []>} : vector<2x256xf32>, vector<256x128xf32>, vector<2x128xf32> -> vector<2x128xf32>
    %c0_3 = arith.constant 0 : index
    %c0_4 = arith.constant 0 : index
    %3 = vector.load %arg3[%c0_3, %c0_4] : memref<1x128xf32, #tpu.memory_space<vmem>>, vector<1x128xf32>
    %4 = vector.broadcast %3 : vector<1x128xf32> to vector<2x128xf32>
    %5 = arith.addf %2, %4 : vector<2x128xf32>
    %c0_5 = arith.constant 0 : index
    %c0_6 = arith.constant 0 : index
    %6 = vector.load %arg4[%c0_5, %c0_6] : memref<2x128xf32, #tpu.memory_space<vmem>>, vector<2x128xf32>
    tpu.vector_store %arg4[%c0_5, %c0_6], %5 {strides = array<i32>} : memref<2x128xf32, #tpu.memory_space<vmem>>, vector<2x128xf32>,
    return
  }
  func.func @transform_0(%arg0: i32) -> (i32, i32) {
    %c0_i32 = arith.constant 0 : i32
    %c0_i32_0 = arith.constant 0 : i32
    return %arg0, %c0_i32 : i32, i32
  }
  func.func @transform_1(%arg0: i32) -> (i32, i32) {
    %c0_i32 = arith.constant 0 : i32
    %c0_i32_0 = arith.constant 0 : i32
    %c0_i32_1 = arith.constant 0 : i32
    return %c0_i32, %c0_i32_0 : i32, i32
  }
  func.func @transform_2(%arg0: i32) -> (i32, i32) {
    %c0_i32 = arith.constant 0 : i32
    %c0_i32_0 = arith.constant 0 : i32
    %c0_i32_1 = arith.constant 0 : i32
    return %c0_i32, %c0_i32_0 : i32, i32
  }
  func.func @transform_3(%arg0: i32) -> (i32, i32) {
    %c0_i32 = arith.constant 0 : i32
    %c0_i32_0 = arith.constant 0 : i32
    return %arg0, %c0_i32 : i32, i32
  }
}

</mosaic_0001>

<bundles_post_ra>
// kernel: tpu_custom_call.1
= control target key start
LH: loop header
LB: loop body
LE: loop exit
PB: predicated region body
PF: predicated region fallthrough
CT: control target
= control target key end

     0   :  { %8 = vsyncpa [#allocation3], 0  ;;  %s396_s0 = inlined_call_operand.hbm [shape: f32[2,256], index: 0, kind: input, shape index: {}]   ;;  %s397_s1 = inlined_call_operand.hbm [shape: f32[256,128], index: 1, kind: input, shape index: {}]   ;;  %s398_s2 = inlined_call_operand.vmem [shape: f32[1,128], index: 2, kind: input, shape index: {}]   ;;  %s399_s3 = inlined_call_operand.hbm [shape: f32[2,128], index: 3, kind: output, shape index: {}]  }
   0x1   :  { %9 = vsyncpa [#allocation6], 0 }
   0x2   :  { %10 = vsyncpa [#allocation4], 0  ;;  %s325_s12 = smov [#allocation2]   ;;  %s326_s14 = smov [#allocation5]  }
   0x3   :  { %s17_s13 = sshll.u32 %s325_s12, 4  ;;  %s26_s15 = sshll.u32 %s326_s14, 4  ;;  %s18_s13 = int_to_ptr.vmem [resolvable:$true] %s17_s13  ;;  %s350_s15 = int_to_ptr.vmem [resolvable:$true] %s26_s15 }
   0x4   :  { %s253_s18 = scalar_lea.hbm %s396_s0, 64 }
   0x5   :  { %p254_p0 = scmp.ne.s32.totalorder %s396_s0, %s253_s18  ;;  %p257_p1 = scmp.lt.u32.totalorder %s253_s18, %s396_s0 }
   0x7   :  { %p259_p2 = pnand %p257_p1, %p254_p0 }
   0x9   :  { %262 = shalt.err (!%p259_p2)
}
   0xa   :  { %s263_s23 = scalar_lea.vmem %s18_s13, 64  ;;  %p268_p4 = scmp.lt.s32.totalorder %s18_s13, %s18_s13 }
   0xb   :  { %p264_p3 = scmp.ne.s32.totalorder %s18_s13, %s263_s23  ;;  %p269_p5 = scmp.lt.s32.totalorder %s263_s23, %s263_s23 }
   0xd   :  { %p270_p6 = por %p269_p5, %p268_p4 }
   0xf   :  { %p271_p7 = pnand %p270_p6, %p264_p3 }
  0x11   :  { %274 = shalt.err (!%p271_p7)
}
  0x12   :  { %20 = dma.hbm_to_vmem [thread:$0]  %s396_s0, 64, %s18_s13, [#allocation3]  }
  0x13   :  { %s275_s28 = scalar_lea.hbm %s397_s1, 4096 }
  0x14   :  { %p276_p8 = scmp.ne.s32.totalorder %s397_s1, %s275_s28  ;;  %p279_p9 = scmp.lt.u32.totalorder %s275_s28, %s397_s1 }
  0x16   :  { %p281_p10 = pnand %p279_p9, %p276_p8 }
  0x18   :  { %284 = shalt.err (!%p281_p10)
}
  0x19   :  { %s285_s6 = scalar_lea.vmem %s350_s15, 4096  ;;  %p290_p12 = scmp.lt.s32.totalorder %s350_s15, %s350_s15 }
  0x1a   :  { %p286_p11 = scmp.ne.s32.totalorder %s350_s15, %s285_s6  ;;  %p291_p13 = scmp.lt.s32.totalorder %s285_s6, %s285_s6 }
  0x1c   :  { %p292_p0 = por %p291_p13, %p290_p12 }
  0x1e   :  { %p293_p1 = pnand %p292_p0, %p286_p11 }
  0x20   :  { %296 = shalt.err (!%p293_p1)
}
  0x21   :  { %s327_s0 = smov 128   ;;  %s328_s7 = smov 8  }
  0x22   :  { %32 = dma.hbm_to_vmem [thread:$0]  %s397_s1, 4096, %s350_s15, [#allocation6], %s327_s0, %s327_s0, %s328_s7  }
  0x23   :  { %319 = dma.done.wait [#allocation3], 64  }
  0x24   :  { %320 = vsyncadd [#allocation3], 4294967232 }
  0x25   :  { %321 = dma.done.wait [#allocation6], 4096  }
  0x26   :  { %322 = vsyncadd [#allocation6], 4294963200  ;;  %v58_v0 = vld [vmem:[#allocation5 + $0x80] sm:$0xff]  ;;  %v59_v1 = vld [vmem:[#allocation5 + $0x88] sm:$0xff]  ;;  %s329_s11 = smov [#allocation7]  }
  0x27   :  { %v42_v2 = vld [vmem:[#allocation5] sm:$0xff]  ;;  %v216_v3 = vpack.c.bf16 %v59_v1, %v58_v0  ;;  %v43_v4 = vld [vmem:[#allocation5 + $0x8] sm:$0xff]  ;;  %v60_v5 = vld [vmem:[#allocation5 + $0x90] sm:$0xff]  ;;  %s169_s12 = sshll.u32 %s329_s11, 4  ;;  %s170_s12 = int_to_ptr.vmem [resolvable:$true] %s169_s12 }
  0x28   :  { %v61_v6 = vld [vmem:[#allocation5 + $0x98] sm:$0xff]  ;;  %v218_v7 = vpack.c.bf16 %v43_v4, %v42_v2  ;;  %v44_v9 = vld [vmem:[#allocation5 + $0x10] sm:$0xff]  ;;  %v62_v11 = vld [vmem:[#allocation5 + $0xa0] sm:$0xff]  ;;  %s297_s13 = scalar_lea.vmem %s170_s12, 32  ;;  %p302_p3 = scmp.lt.s32.totalorder %s170_s12, %s170_s12 }
  0x29   :  { %v220_v8 = vpack.c.bf16 %v61_v6, %v60_v5  ;;  %v45_v10 = vld [vmem:[#allocation5 + $0x18] sm:$0xff]  ;;  %217 = vmatprep.subr.bf16.mxu0 %v216_v3  ;;  %v63_v12 = vld [vmem:[#allocation5 + $0xa8] sm:$0xff]  ;;  %v46_v15 = vld [vmem:[#allocation5 + $0x20] sm:$0xff]  ;;  %p298_p2 = scmp.ne.s32.totalorder %s170_s12, %s297_s13  ;;  %p303_p4 = scmp.lt.s32.totalorder %s297_s13, %s297_s13 }
  0x2a   :  { %219 = vmatpush3.bf16.msra.mxu0 %v218_v7  ;;  %v222_v13 = vpack.c.bf16 %v45_v10, %v44_v9  ;;  %v224_v14 = vpack.c.bf16 %v63_v12, %v62_v11  ;;  %v47_v16 = vld [vmem:[#allocation5 + $0x28] sm:$0xff]  ;;  %v64_v17 = vld [vmem:[#allocation5 + $0xb0] sm:$0xff]  ;;  %v65_v18 = vld [vmem:[#allocation5 + $0xb8] sm:$0xff] }
  0x2b   :  { %221 = vmatprep.subr.bf16.mxu0 %v220_v8  ;;  %v226_v19 = vpack.c.bf16 %v47_v16, %v46_v15  ;;  %v228_v20 = vpack.c.bf16 %v65_v18, %v64_v17  ;;  %v48_v21 = vld [vmem:[#allocation5 + $0x30] sm:$0xff]  ;;  %v49_v22 = vld [vmem:[#allocation5 + $0x38] sm:$0xff]  ;;  %v66_v23 = vld [vmem:[#allocation5 + $0xc0] sm:$0xff]  ;;  %p304_p5 = por %p303_p4, %p302_p3 }
  0x2c   :  { %v67_v24 = vld [vmem:[#allocation5 + $0xc8] sm:$0xff]  ;;  %v180_v25 = vld.sshfl [vmem:[#allocation2] sm:$0x33 pattern:$0x76325410]  ;;  %v230_v27 = vpack.c.bf16 %v49_v22, %v48_v21  ;;  %v50_v29 = vld [vmem:[#allocation5 + $0x40] sm:$0xff] }
  0x2d   :  { %v89_v26 = vcombine.high %v180_v25, %v180_v25  ;;  %v232_v28 = vpack.c.bf16 %v67_v24, %v66_v23  ;;  %v51_v30 = vld [vmem:[#allocation5 + $0x48] sm:$0xff]  ;;  %v68_v31 = vld [vmem:[#allocation5 + $0xd0] sm:$0xff]  ;;  %v69_v32 = vld [vmem:[#allocation5 + $0xd8] sm:$0xff]  ;;  %p305_p6 = pnand %p304_p5, %p298_p2 }
  0x2e   :  { %223 = vmatpush3.bf16.msra.mxu0 %v222_v13  ;;  %v234_v33 = vpack.c.bf16 %v51_v30, %v50_v29  ;;  %v236_v34 = vpack.c.bf16 %v69_v32, %v68_v31  ;;  %v52_v35 = vld [vmem:[#allocation5 + $0x50] sm:$0xff]  ;;  %v53_v36 = vld [vmem:[#allocation5 + $0x58] sm:$0xff]  ;;  %v70_v37 = vld [vmem:[#allocation5 + $0xe0] sm:$0xff] }
  0x2f   :  { %225 = vmatprep.subr.bf16.mxu0 %v224_v14  ;;  %156 = vmatprep.mubr.f32.mxu0 %v89_v26  ;;  %v71_v38 = vld [vmem:[#allocation5 + $0xe8] sm:$0xff]  ;;  %v238_v39 = vpack.c.bf16 %v53_v36, %v52_v35  ;;  %v54_v41 = vld [vmem:[#allocation5 + $0x60] sm:$0xff]  ;;  %v72_v43 = vld [vmem:[#allocation5 + $0xf0] sm:$0xff] }
  0x30   :  { %v240_v40 = vpack.c.bf16 %v71_v38, %v70_v37  ;;  %v55_v42 = vld [vmem:[#allocation5 + $0x68] sm:$0xff]  ;;  %v73_v44 = vld [vmem:[#allocation5 + $0xf8] sm:$0xff]  ;;  %v56_v47 = vld [vmem:[#allocation5 + $0x70] sm:$0xff] }
  0x31   :  { %v242_v45 = vpack.c.bf16 %v55_v42, %v54_v41  ;;  %v244_v46 = vpack.c.bf16 %v73_v44, %v72_v43  ;;  %v57_v48 = vld [vmem:[#allocation5 + $0x78] sm:$0xff] }
  0x32   :  { %227 = vmatpush3.bf16.msra.mxu0 %v226_v19  ;;  %v246_v49 = vpack.c.bf16 %v57_v48, %v56_v47  ;;  %v179_v51 = vld [vmem:[%s398_s2] ss:$0 sm:$0xff] }
  0x33   :  { %229 = vmatprep.subr.bf16.mxu0 %v228_v20 }
  0x36   :  { %231 = vmatpush3.bf16.msra.mxu0 %v230_v27 }
  0x37   :  { %233 = vmatprep.subr.bf16.mxu0 %v232_v28 }
  0x3a   :  { %235 = vmatpush3.bf16.msra.mxu0 %v234_v33 }
  0x3b   :  { %237 = vmatprep.subr.bf16.mxu0 %v236_v34 }
  0x3e   :  { %239 = vmatpush3.bf16.msra.mxu0 %v238_v39 }
  0x3f   :  { %241 = vmatprep.subr.bf16.mxu0 %v240_v40 }
  0x42   :  { %243 = vmatpush3.bf16.msra.mxu0 %v242_v45 }
  0x43   :  { %245 = vmatprep.subr.bf16.mxu0 %v244_v46 }
  0x46   :  { %247 = vmatpush3.bf16.msra.mxu0 %v246_v49 }
  0x49   :  { %157 = vmatmul.mubr.f32.vlgmr.msra.gmra.mrb[0].mxu0 %v180_v25 }
 0x11c   :  { %v213_v50 = vpop.f32.mrb[0].mxu0 }
 0x11d   :  { %v214_v52 = vpop.f32.mrb[1].mxu0 }
 0x11e   :  { %v215_v53 = vadd.f32 %v214_v52, %v213_v50 }
 0x120   :  { %v159_v54 = vadd.f32 %v215_v53, %v179_v51 }
 0x122   :  { %162 = vst [vmem:[#allocation7] sm:$0x3] %v159_v54 }
 0x123   :  { %308 = shalt.err (!%p305_p6)
}
 0x124   :  { %s309_s16 = scalar_lea.hbm %s399_s3, 32 }
 0x125   :  { %p310_p7 = scmp.ne.s32.totalorder %s399_s3, %s309_s16  ;;  %p313_p8 = scmp.lt.u32.totalorder %s309_s16, %s399_s3 }
 0x127   :  { %p315_p9 = pnand %p313_p8, %p310_p7 }
 0x129   :  { %318 = shalt.err (!%p315_p9)
}
 0x12a   :  { %172 = dma.vmem_to_hbm [thread:$0]  %s170_s12, 32, %s399_s3, [#allocation4]  }
 0x12b   :  { %323 = dma.done.wait [#allocation4], 32  }
 0x12c   :  { %324 = vsyncadd [#allocation4], 4294967264 }
 0x12d   :  { %176 = vsyncpa [#allocation3], 1 }
 0x12e   :  { %177 = vsyncpa [#allocation6], 1 }
 0x12f   :  { %178 = vsyncpa [#allocation4], 1 }

</bundles_post_ra>
